<compile_context>
chip_gen: v6e
topology: v6e:2x2x1
jax: 0.10.0
libtpu: 0.0.40
codegen_flags: <defaults>
</compile_context>

<pallas_src>
import functools

import jax
import jax.numpy as jnp
from jax.experimental import pallas as pl
from jax.experimental.pallas import tpu as pltpu

PATCH = 3
PAD = PATCH // 2
NUM_PAIRS = 4


def geometry_kernel(mask_ref, x_ref, y_ref, out_ref, *, W, HWp, TC, CSUB):
    # mask_ref: (4, HWp) resident combined masks (interior + shifted interior).
    # x_ref / y_ref: (1, TC, HWp) f32 blocks in VMEM.
    # out_ref: (1, 1, 1, 1) per-(batch, group) partial sum, resident across
    #          the channel-tile (last, "arbitrary") grid axis.
    c_step = pl.program_id(2)

    @pl.when(c_step == 0)
    def _():
        out_ref[...] = jnp.zeros_like(out_ref)

    # Positive flat offsets of the 4 +/- neighbour pairs; the centre offset is
    # identically zero and skipped.
    pair_offsets = (1, W - 1, W, W + 1)
    # Hoisted mask loads (once per grid step); each is (1, HWp).
    masks = [mask_ref[pl.ds(pi, 1), :] for pi in range(NUM_PAIRS)]

    def chunk_partial(xc, yc):
        acc = jnp.zeros(xc.shape, jnp.float32)
        for pi, s in enumerate(pair_offsets):
            shift = (HWp - s) % HWp                  # out[q] = in[q + s]
            px = pltpu.roll(xc, shift=shift, axis=1)  # XLU slot
            py = pltpu.roll(yc, shift=shift, axis=1)
            dx = px - xc                              # loc_diff for x
            dy = py - yc                              # loc_diff for y
            nx = dx * jax.lax.rsqrt(0.81 + dx * dx)   # loc_diff_norm x
            ny = dy * jax.lax.rsqrt(0.81 + dy * dy)   # loc_diff_norm y
            d = nx - ny
            dd = d * d
            term = dd * pl.reciprocal(dd + 0.1, approx=True)   # EUP slot
            acc = acc + term * masks[pi]              # +s and mirrored -s offset
        return jnp.sum(acc)

    n_chunks = TC // CSUB
    if n_chunks == 1:
        partial = chunk_partial(x_ref[0], y_ref[0])
    else:
        def body(ci, carry):
            c0 = pl.multiple_of(ci * CSUB, CSUB)
            xc = x_ref[0, pl.ds(c0, CSUB), :]
            yc = y_ref[0, pl.ds(c0, CSUB), :]
            return carry + chunk_partial(xc, yc)

        partial = jax.lax.fori_loop(0, n_chunks, body,
                                    jnp.zeros((), jnp.float32))

    out_ref[...] += partial        # normalisations applied in the wrapper


def _pick_c_tile(C, HWp, budget_bytes=16 << 20):
    """Largest channel tile whose 2-operand, double-buffered blocks fit."""
    per_chan = HWp * 4                                  # f32 bytes / channel
    cost = lambda tc: 2 * 2 * tc * per_chan             # 2 operands x 2 buffers
    if cost(C) <= budget_bytes:
        return C
    tc = (budget_bytes // (2 * 2 * per_chan)) // 8 * 8
    tc = min(max(int(tc), 8), max((C // 8) * 8, 8))
    # TODO(synk): if even an 8-channel tile exceeds the budget (huge H*W),
    # an extra spatial tiling with a one-row halo would be needed.
    return int(tc)


def _pick_csub(TC, HWp, target_bytes=32 << 10):
    """Channel sub-chunk sized so per-chunk temporaries stay in vregs."""
    if TC % 8 != 0:
        return TC
    best = 8
    for c in range(8, TC + 1, 8):
        if TC % c == 0 and c * HWp * 4 <= target_bytes:
            best = c
    return best


@jax.jit
def geometry_loss(x, y):
    B, C, H, W = x.shape
    HW = H * W
    HWp = max(128, ((HW + 127) // 128) * 128)   # lane-dense flattened spatial

    xf = x.astype(jnp.float32).reshape(B, C, HW)
    yf = y.astype(jnp.float32).reshape(B, C, HW)
    if HWp != HW:
        pad = ((0, 0), (0, 0), (0, HWp - HW))
        xf = jnp.pad(xf, pad)
        yf = jnp.pad(yf, pad)

    TC = _pick_c_tile(C, HWp)
    n_ct = (C + TC - 1) // TC
    # Second parallel axis (channel groups) to feed both v7x TensorCores when
    # B is small; no-op on 1-TC chips and when the tile count is odd / 1.
    n_grp = 2 if (n_ct >= 2 and n_ct % 2 == 0) else 1
    n_ci = n_ct // n_grp
    C_pad = n_ct * TC
    if C_pad != C:
        cpad = ((0, 0), (0, C_pad - C), (0, 0))
        xf = jnp.pad(xf, cpad)          # zero channels contribute exactly 0
        yf = jnp.pad(yf, cpad)

    CSUB = _pick_csub(TC, HWp)

    # Interior (valid_mask) and, per +/- offset pair, the combined
    # (interior + shifted-interior) mask.  Static -> built once here.
    row = jnp.arange(H)[:, None]
    col = jnp.arange(W)[None, :]
    interior2d = ((row >= PAD) & (row < H - PAD) &
                  (col >= PAD) & (col < W - PAD)).astype(jnp.float32)
    interior = jnp.pad(interior2d.reshape(HW), (0, HWp - HW))
    pair_offsets = (1, W - 1, W, W + 1)
    masks = jnp.stack(
        [interior + jnp.roll(interior, -s) for s in pair_offsets], axis=0)

    est = (2 * 2 * TC * HWp * 4          # x, y double-buffered blocks
           + 2 * NUM_PAIRS * HWp * 4     # resident mask block
           + 12 * CSUB * HWp * 4         # live temporaries of one chunk
           + (2 << 20))                  # headroom / internal scratch
    vmem_limit = int(min(max(est, 32 << 20), 48 << 20))

    kernel = functools.partial(geometry_kernel, W=W, HWp=HWp, TC=TC, CSUB=CSUB)

    partials = pl.pallas_call(
        kernel,
        out_shape=jax.ShapeDtypeStruct((B, n_grp, 1, 1), jnp.float32),
        grid=(B, n_grp, n_ci),
        in_specs=[
            pl.BlockSpec((NUM_PAIRS, HWp), lambda b, g, c: (0, 0)),
            pl.BlockSpec((1, TC, HWp), lambda b, g, c: (b, g * n_ci + c, 0)),
            pl.BlockSpec((1, TC, HWp), lambda b, g, c: (b, g * n_ci + c, 0)),
        ],
        out_specs=pl.BlockSpec((1, 1, 1, 1), lambda b, g, c: (b, g, 0, 0)),
        compiler_params=pltpu.CompilerParams(
            dimension_semantics=("parallel", "parallel", "arbitrary"),
            vmem_limit_bytes=vmem_limit),
    )(masks, xf, yf)

    # torch: dist = mean over the C*9 offset-channels; loss = mean over
    # the (B, 1, H, W) tensor  ->  grand_sum / (C*9*B*H*W).
    return jnp.sum(partials) / (C * PATCH * PATCH * B * H * W)


def _reference_loss(x, y):
    """Pure-JAX reference mirroring the PyTorch module (sanity check)."""
    B, C, H, W = x.shape

    def transform(t):
        tp = jnp.pad(t, ((0, 0), (0, 0), (PAD, PAD), (PAD, PAD)))
        center = tp[:, :, PAD:PAD + H, PAD:PAD + W]
        diffs = []
        for di in range(PATCH):
            for dj in range(PATCH):
                d = tp[:, :, di:di + H, dj:dj + W] - center
                diffs.append(d / jnp.sqrt(0.81 + d * d))
        return jnp.stack(diffs, axis=2).reshape(B, C * PATCH * PATCH, H, W)

    diff = transform(x) - transform(y)
    dist = jnp.mean(diff ** 2 / (0.1 + diff ** 2), axis=1, keepdims=True)
    mask = jnp.zeros((B, 1, H, W)).at[:, :, PAD:H - PAD, PAD:W - PAD].set(1.0)
    return jnp.mean(dist * mask)


if __name__ == "__main__":
    key = jax.random.PRNGKey(0)
    kx, ky = jax.random.split(key)
    B, C, H, W = 2, 4, 16, 16
    x = jax.random.normal(kx, (B, C, H, W), dtype=jnp.float32)
    y = jax.random.normal(ky, (B, C, H, W), dtype=jnp.float32)

    loss = geometry_loss(x, y)
    jax.block_until_ready(loss)

    ref = _reference_loss(x, y)
    # approx=True EUP reciprocal -> loosen tolerance slightly vs exact ref.
    assert jnp.allclose(loss, ref, rtol=2e-3, atol=1e-5), (loss, ref)

    print("KERNEL_OK")
</pallas_src>

<mosaic_0001>
module attributes {stable_mosaic.version = 11 : i64} {
  func.func @geometry_kernel(%arg0: i32, %arg1: i32, %arg2: i32, %arg3: memref<4x256xf32, #tpu.memory_space<vmem>>, %arg4: memref<1x4x256xf32, #tpu.memory_space<vmem>>, %arg5: memref<1x4x256xf32, #tpu.memory_space<vmem>>, %arg6: memref<1x1x1x1xf32, #tpu.memory_space<vmem>>) attributes {dimension_semantics = [#tpu.dimension_semantics<parallel>, #tpu.dimension_semantics<parallel>, #tpu.dimension_semantics<arbitrary>], iteration_bounds = array<i64: 2, 1, 1>, scalar_prefetch = 0 : i64, scratch_operands = 0 : i64, tpu.core_type = #tpu.core_type<tc>, window_params = [{pipeline_mode = #tpu.pipeline_mode<synchronous>, transform_indices = @transform_0, window_bounds = array<i64: 4, 256>}, {transform_indices = @transform_1, window_bounds = array<i64: 1, 4, 256>}, {transform_indices = @transform_2, window_bounds = array<i64: 1, 4, 256>}, {transform_indices = @transform_3, window_bounds = array<i64: 1, 1, 1, 1>}]} {
    %c0_i32 = arith.constant 0 : i32
    %0 = arith.cmpi eq, %arg2, %c0_i32 : i32
    %1 = arith.extui %0 : i1 to i32
    %c0_i32_0 = arith.constant 0 : i32
    %2 = arith.cmpi ne, %1, %c0_i32_0 : i32
    scf.if %2 {
      %cst_36 = arith.constant 0.000000e+00 : f32
      %112 = vector.broadcast %cst_36 : f32 to vector<1x1x1x1xf32>
      %c0_37 = arith.constant 0 : index
      %c0_38 = arith.constant 0 : index
      %c0_39 = arith.constant 0 : index
      %c0_40 = arith.constant 0 : index
      %113 = vector.load %arg6[%c0_37, %c0_38, %c0_39, %c0_40] : memref<1x1x1x1xf32, #tpu.memory_space<vmem>>, vector<1x1x1x1xf32>
      tpu.vector_store %arg6[%c0_37, %c0_38, %c0_39, %c0_40], %112 {strides = array<i32>} : memref<1x1x1x1xf32, #tpu.memory_space<vmem>>, vector<1x1x1x1xf32>,
    } else {
    }
    %c0 = arith.constant 0 : index
    %c0_1 = arith.constant 0 : index
    %3 = vector.load %arg3[%c0, %c0_1] : memref<4x256xf32, #tpu.memory_space<vmem>>, vector<1x256xf32>
    %c1 = arith.constant 1 : index
    %c0_2 = arith.constant 0 : index
    %4 = vector.load %arg3[%c1, %c0_2] : memref<4x256xf32, #tpu.memory_space<vmem>>, vector<1x256xf32>
    %c2 = arith.constant 2 : index
    %c0_3 = arith.constant 0 : index
    %5 = vector.load %arg3[%c2, %c0_3] : memref<4x256xf32, #tpu.memory_space<vmem>>, vector<1x256xf32>
    %c3 = arith.constant 3 : index
    %c0_4 = arith.constant 0 : index
    %6 = vector.load %arg3[%c3, %c0_4] : memref<4x256xf32, #tpu.memory_space<vmem>>, vector<1x256xf32>
    %c0_5 = arith.constant 0 : index
    %c0_6 = arith.constant 0 : index
    %c0_7 = arith.constant 0 : index
    %7 = vector.load %arg4[%c0_5, %c0_6, %c0_7] : memref<1x4x256xf32, #tpu.memory_space<vmem>>, vector<1x4x256xf32>
    %8 = vector.shape_cast %7 : vector<1x4x256xf32> to vector<4x256xf32>
    %c0_8 = arith.constant 0 : index
    %c0_9 = arith.constant 0 : index
    %c0_10 = arith.constant 0 : index
    %9 = vector.load %arg5[%c0_8, %c0_9, %c0_10] : memref<1x4x256xf32, #tpu.memory_space<vmem>>, vector<1x4x256xf32>
    %10 = vector.shape_cast %9 : vector<1x4x256xf32> to vector<4x256xf32>
    %cst = arith.constant 0.000000e+00 : f32
    %11 = vector.broadcast %cst : f32 to vector<4x256xf32>
    %c255_i32 = arith.constant 255 : i32
    %12 = tpu.dynamic_rotate %8 by %c255_i32 dim 1 : vector<4x256xf32>, i32 -> vector<4x256xf32>
    %c255_i32_11 = arith.constant 255 : i32
    %13 = tpu.dynamic_rotate %10 by %c255_i32_11 dim 1 : vector<4x256xf32>, i32 -> vector<4x256xf32>
    %14 = arith.subf %12, %8 : vector<4x256xf32>
    %15 = arith.subf %13, %10 : vector<4x256xf32>
    %16 = arith.mulf %14, %14 : vector<4x256xf32>
    %cst_12 = arith.constant 8.100000e-01 : f32
    %17 = vector.broadcast %cst_12 : f32 to vector<4x256xf32>
    %18 = arith.addf %17, %16 : vector<4x256xf32>
    %19 = math.rsqrt %18 : vector<4x256xf32>
    %20 = arith.mulf %14, %19 : vector<4x256xf32>
    %21 = arith.mulf %15, %15 : vector<4x256xf32>
    %cst_13 = arith.constant 8.100000e-01 : f32
    %22 = vector.broadcast %cst_13 : f32 to vector<4x256xf32>
    %23 = arith.addf %22, %21 : vector<4x256xf32>
    %24 = math.rsqrt %23 : vector<4x256xf32>
    %25 = arith.mulf %15, %24 : vector<4x256xf32>
    %26 = arith.subf %20, %25 : vector<4x256xf32>
    %27 = arith.mulf %26, %26 : vector<4x256xf32>
    %cst_14 = arith.constant 1.000000e-01 : f32
    %28 = vector.broadcast %cst_14 : f32 to vector<4x256xf32>
    %29 = arith.addf %27, %28 : vector<4x256xf32>
    %30 = tpu.reciprocal %29 {approx = true} : vector<4x256xf32> -> vector<4x256xf32>
    %31 = arith.mulf %27, %30 : vector<4x256xf32>
    %32 = vector.broadcast %3 : vector<1x256xf32> to vector<4x256xf32>
    %33 = arith.mulf %31, %32 : vector<4x256xf32>
    %34 = arith.addf %11, %33 : vector<4x256xf32>
    %c241_i32 = arith.constant 241 : i32
    %35 = tpu.dynamic_rotate %8 by %c241_i32 dim 1 : vector<4x256xf32>, i32 -> vector<4x256xf32>
    %c241_i32_15 = arith.constant 241 : i32
    %36 = tpu.dynamic_rotate %10 by %c241_i32_15 dim 1 : vector<4x256xf32>, i32 -> vector<4x256xf32>
    %37 = arith.subf %35, %8 : vector<4x256xf32>
    %38 = arith.subf %36, %10 : vector<4x256xf32>
    %39 = arith.mulf %37, %37 : vector<4x256xf32>
    %cst_16 = arith.constant 8.100000e-01 : f32
    %40 = vector.broadcast %cst_16 : f32 to vector<4x256xf32>
    %41 = arith.addf %40, %39 : vector<4x256xf32>
    %42 = math.rsqrt %41 : vector<4x256xf32>
    %43 = arith.mulf %37, %42 : vector<4x256xf32>
    %44 = arith.mulf %38, %38 : vector<4x256xf32>
    %cst_17 = arith.constant 8.100000e-01 : f32
    %45 = vector.broadcast %cst_17 : f32 to vector<4x256xf32>
    %46 = arith.addf %45, %44 : vector<4x256xf32>
    %47 = math.rsqrt %46 : vector<4x256xf32>
    %48 = arith.mulf %38, %47 : vector<4x256xf32>
    %49 = arith.subf %43, %48 : vector<4x256xf32>
    %50 = arith.mulf %49, %49 : vector<4x256xf32>
    %cst_18 = arith.constant 1.000000e-01 : f32
    %51 = vector.broadcast %cst_18 : f32 to vector<4x256xf32>
    %52 = arith.addf %50, %51 : vector<4x256xf32>
    %53 = tpu.reciprocal %52 {approx = true} : vector<4x256xf32> -> vector<4x256xf32>
    %54 = arith.mulf %50, %53 : vector<4x256xf32>
    %55 = vector.broadcast %4 : vector<1x256xf32> to vector<4x256xf32>
    %56 = arith.mulf %54, %55 : vector<4x256xf32>
    %57 = arith.addf %34, %56 : vector<4x256xf32>
    %c240_i32 = arith.constant 240 : i32
    %58 = tpu.dynamic_rotate %8 by %c240_i32 dim 1 : vector<4x256xf32>, i32 -> vector<4x256xf32>
    %c240_i32_19 = arith.constant 240 : i32
    %59 = tpu.dynamic_rotate %10 by %c240_i32_19 dim 1 : vector<4x256xf32>, i32 -> vector<4x256xf32>
    %60 = arith.subf %58, %8 : vector<4x256xf32>
    %61 = arith.subf %59, %10 : vector<4x256xf32>
    %62 = arith.mulf %60, %60 : vector<4x256xf32>
    %cst_20 = arith.constant 8.100000e-01 : f32
    %63 = vector.broadcast %cst_20 : f32 to vector<4x256xf32>
    %64 = arith.addf %63, %62 : vector<4x256xf32>
    %65 = math.rsqrt %64 : vector<4x256xf32>
    %66 = arith.mulf %60, %65 : vector<4x256xf32>
    %67 = arith.mulf %61, %61 : vector<4x256xf32>
    %cst_21 = arith.constant 8.100000e-01 : f32
    %68 = vector.broadcast %cst_21 : f32 to vector<4x256xf32>
    %69 = arith.addf %68, %67 : vector<4x256xf32>
    %70 = math.rsqrt %69 : vector<4x256xf32>
    %71 = arith.mulf %61, %70 : vector<4x256xf32>
    %72 = arith.subf %66, %71 : vector<4x256xf32>
    %73 = arith.mulf %72, %72 : vector<4x256xf32>
    %cst_22 = arith.constant 1.000000e-01 : f32
    %74 = vector.broadcast %cst_22 : f32 to vector<4x256xf32>
    %75 = arith.addf %73, %74 : vector<4x256xf32>
    %76 = tpu.reciprocal %75 {approx = true} : vector<4x256xf32> -> vector<4x256xf32>
    %77 = arith.mulf %73, %76 : vector<4x256xf32>
    %78 = vector.broadcast %5 : vector<1x256xf32> to vector<4x256xf32>
    %79 = arith.mulf %77, %78 : vector<4x256xf32>
    %80 = arith.addf %57, %79 : vector<4x256xf32>
    %c239_i32 = arith.constant 239 : i32
    %81 = tpu.dynamic_rotate %8 by %c239_i32 dim 1 : vector<4x256xf32>, i32 -> vector<4x256xf32>
    %c239_i32_23 = arith.constant 239 : i32
    %82 = tpu.dynamic_rotate %10 by %c239_i32_23 dim 1 : vector<4x256xf32>, i32 -> vector<4x256xf32>
    %83 = arith.subf %81, %8 : vector<4x256xf32>
    %84 = arith.subf %82, %10 : vector<4x256xf32>
    %85 = arith.mulf %83, %83 : vector<4x256xf32>
    %cst_24 = arith.constant 8.100000e-01 : f32
    %86 = vector.broadcast %cst_24 : f32 to vector<4x256xf32>
    %87 = arith.addf %86, %85 : vector<4x256xf32>
    %88 = math.rsqrt %87 : vector<4x256xf32>
    %89 = arith.mulf %83, %88 : vector<4x256xf32>
    %90 = arith.mulf %84, %84 : vector<4x256xf32>
    %cst_25 = arith.constant 8.100000e-01 : f32
    %91 = vector.broadcast %cst_25 : f32 to vector<4x256xf32>
    %92 = arith.addf %91, %90 : vector<4x256xf32>
    %93 = math.rsqrt %92 : vector<4x256xf32>
    %94 = arith.mulf %84, %93 : vector<4x256xf32>
    %95 = arith.subf %89, %94 : vector<4x256xf32>
    %96 = arith.mulf %95, %95 : vector<4x256xf32>
    %cst_26 = arith.constant 1.000000e-01 : f32
    %97 = vector.broadcast %cst_26 : f32 to vector<4x256xf32>
    %98 = arith.addf %96, %97 : vector<4x256xf32>
    %99 = tpu.reciprocal %98 {approx = true} : vector<4x256xf32> -> vector<4x256xf32>
    %100 = arith.mulf %96, %99 : vector<4x256xf32>
    %101 = vector.broadcast %6 : vector<1x256xf32> to vector<4x256xf32>
    %102 = arith.mulf %100, %101 : vector<4x256xf32>
    %103 = arith.addf %80, %102 : vector<4x256xf32>
    %104 = vector.shape_cast %103 : vector<4x256xf32> to vector<1x4x256xf32>
    %cst_27 = arith.constant dense<0.000000e+00> : vector<1xf32>
    %105 = vector.multi_reduction <add>, %104, %cst_27 [1, 2] : vector<1x4x256xf32> to vector<1xf32>
    %106 = vector.shape_cast %105 : vector<1xf32> to vector<1x1x1xf32>
    %107 = vector.extract %106[0, 0, 0] : f32 from vector<1x1x1xf32>
    %c0_28 = arith.constant 0 : index
    %c0_29 = arith.constant 0 : index
    %c0_30 = arith.constant 0 : index
    %c0_31 = arith.constant 0 : index
    %108 = vector.load %arg6[%c0_28, %c0_29, %c0_30, %c0_31] : memref<1x1x1x1xf32, #tpu.memory_space<vmem>>, vector<1x1x1x1xf32>
    %109 = vector.broadcast %107 : f32 to vector<1x1x1x1xf32>
    %110 = arith.addf %108, %109 : vector<1x1x1x1xf32>
    %c0_32 = arith.constant 0 : index
    %c0_33 = arith.constant 0 : index
    %c0_34 = arith.constant 0 : index
    %c0_35 = arith.constant 0 : index
    %111 = vector.load %arg6[%c0_32, %c0_33, %c0_34, %c0_35] : memref<1x1x1x1xf32, #tpu.memory_space<vmem>>, vector<1x1x1x1xf32>
    tpu.vector_store %arg6[%c0_32, %c0_33, %c0_34, %c0_35], %110 {strides = array<i32>} : memref<1x1x1x1xf32, #tpu.memory_space<vmem>>, vector<1x1x1x1xf32>,
    return
  }
  func.func @transform_0(%arg0: i32, %arg1: i32, %arg2: i32) -> (i32, i32) {
    %c0_i32 = arith.constant 0 : i32
    %c0_i32_0 = arith.constant 0 : i32
    %c0_i32_1 = arith.constant 0 : i32
    return %c0_i32, %c0_i32_0 : i32, i32
  }
  func.func @transform_1(%arg0: i32, %arg1: i32, %arg2: i32) -> (i32, i32, i32) {
    %c1_i32 = arith.constant 1 : i32
    %0 = arith.muli %arg1, %c1_i32 : i32
    %1 = arith.addi %0, %arg2 : i32
    %c0_i32 = arith.constant 0 : i32
    %c0_i32_0 = arith.constant 0 : i32
    return %arg0, %1, %c0_i32 : i32, i32, i32
  }
  func.func @transform_2(%arg0: i32, %arg1: i32, %arg2: i32) -> (i32, i32, i32) {
    %c1_i32 = arith.constant 1 : i32
    %0 = arith.muli %arg1, %c1_i32 : i32
    %1 = arith.addi %0, %arg2 : i32
    %c0_i32 = arith.constant 0 : i32
    %c0_i32_0 = arith.constant 0 : i32
    return %arg0, %1, %c0_i32 : i32, i32, i32
  }
  func.func @transform_3(%arg0: i32, %arg1: i32, %arg2: i32) -> (i32, i32, i32, i32) {
    %c0_i32 = arith.constant 0 : i32
    %c0_i32_0 = arith.constant 0 : i32
    %c0_i32_1 = arith.constant 0 : i32
    return %arg0, %arg1, %c0_i32, %c0_i32_0 : i32, i32, i32, i32
  }
}

</mosaic_0001>

<bundles_post_ra>
// kernel: geometry_loss.1
= control target key start
LH: loop header
LB: loop body
LE: loop exit
PB: predicated region body
PF: predicated region fallthrough
CT: control target
= control target key end

     0   :  { %s773_s12 = smov 0   ;;  %s775_s13 = smov 0   ;;  %s971_s0 = inlined_call_operand.vmem [shape: f32[4,256], index: 0, kind: input, shape index: {}]   ;;  %s972_s1 = inlined_call_operand.vmem [shape: f32[2,4,256], index: 1, kind: input, shape index: {}]   ;;  %s973_s2 = inlined_call_operand.vmem [shape: f32[2,4,256], index: 2, kind: input, shape index: {}]   ;;  %s974_s3 = inlined_call_operand.vmem [shape: f32[2,1,1,1], index: 3, kind: output, shape index: {}]  }
   0x1   :  { %s777_s14 = smov 0  }
   0x2 LB: > { %s32_s15 = sadd.s32 1, %s742_s13  ;;  %p631_p0 = scmp.ge.s32.totalorder %s746_s14, 1  ;;  %s746_s14 = sphi %s777_s14, %s13_s14   ;;  %s742_s13 = sphi %s775_s13, %s976_s13   ;;  %s738_s12 = sphi %s773_s12, %s975_s12  }
   0x3   : > { %p34_p1 = scmp.ge.s32.totalorder %s32_s15, 2  ;;  %p188_p2 = scmp.lt.s32.totalorder %s746_s14, 3 }
   0x5   : > { %s978_s15 = smov (%p34_p1, %s32_s15), 0  ;;  %p189_p3 = pnand %p631_p0, %p188_p2 }
   0x6   : > { %p229_p4 = scmp.lt.s32.totalorder (!%p189_p3), %s738_s12, 1  ;;  %s748_s23 = smov (!%p189_p3), 127  }
   0x7   : > { %192 = sbr.rel (%p189_p3) target bundleno = 417 (0x1a1), region = 32  ;;  %s749_s24 = smov (!%p189_p3), 113  }
   0x8   : > { %s750_s25 = smov (!%p189_p3), 112   ;;  %s751_s26 = smov (!%p189_p3), 111  }
   0xc   : > { %s980_s12 = smov (!%p229_p4, %s738_s12), 1  ;;  %v278_v4 = vlaneseq  ;;  %vm511_vm4 = vcmask 1043456   ;;  %vm260_vm5 = vcmask 0  }
   0xd   : > { %s641_s16 = sshll.u32 %s980_s12, 3  ;;  %s255_s10 = scalar_lea.vmem %s974_s3, %s980_s12 }
   0xe   : > { %s248_s19 = scalar_lea.vmem %s973_s2, %s641_s16  ;;  %s237_s22 = scalar_lea.vmem %s972_s1, %s641_s16  ;;  %v829_v5 = vand.u32 127, %v278_v4 }
   0xf   : > { %v800_v0 = vld [vmem:[%s248_s19] sm:$0xff] }
  0x10   : > { %v802_v1 = vld [vmem:[%s237_s22] sm:$0xff]  ;;  %286 = vrot.lane.b32.xlu1 %v800_v0, %s748_s23  ;;  %v808_v2 = vcombine.high %v800_v0, %v800_v0  ;;  %vm280_vm0 = vcmp.lt.s32.totalorder %v829_v5, 127  ;;  %vm341_vm1 = vcmp.lt.s32.totalorder %v829_v5, 113  ;;  %vm399_vm2 = vcmp.lt.s32.totalorder %v829_v5, 112 }
  0x11   : > { %274 = vrot.lane.b32.xlu0 %v802_v1, %s748_s23  ;;  %v814_v3 = vcombine.high %v802_v1, %v802_v1  ;;  %vm457_vm3 = vcmp.lt.s32.totalorder %v829_v5, 111 }
  0x14   : > { %288 = vrot.lane.b32.xlu1 %v808_v2, %s748_s23 }
  0x15   : > { %337 = vrot.lane.b32.xlu0 %v802_v1, %s749_s24 }
  0x18   : > { %339 = vrot.lane.b32.xlu1 %v814_v3, %s749_s24 }
  0x19   : > { %276 = vrot.lane.b32.xlu0 %v814_v3, %s748_s23 }
  0x1c   : > { %346 = vrot.lane.b32.xlu1 %v808_v2, %s749_s24 }
  0x1d   : > { %344 = vrot.lane.b32.xlu0 %v800_v0, %s749_s24 }
  0x20   : > { %397 = vrot.lane.b32.xlu1 %v814_v3, %s750_s25 }
  0x21   : > { %395 = vrot.lane.b32.xlu0 %v802_v1, %s750_s25 }
  0x24   : > { %404 = vrot.lane.b32.xlu1 %v808_v2, %s750_s25 }
  0x25   : > { %402 = vrot.lane.b32.xlu0 %v800_v0, %s750_s25 }
  0x28   : > { %455 = vrot.lane.b32.xlu1 %v814_v3, %s751_s26 }
  0x29   : > { %453 = vrot.lane.b32.xlu0 %v802_v1, %s751_s26 }
  0x2c   : > { %462 = vrot.lane.b32.xlu1 %v808_v2, %s751_s26 }
  0x2d   : > { %460 = vrot.lane.b32.xlu0 %v800_v0, %s751_s26 }
  0x82   : > { %v287_v6 = vpop.permute.xlu1 %286 }
  0x83   : > { %v275_v7 = vpop.permute.xlu0 %274 }
  0x86   : > { %v289_v8 = vpop.permute.xlu1 %288 }
  0x87   : > { %v338_v9 = vpop.permute.xlu0 %337  ;;  %v290_v10 = vsel %vm280_vm0, %v287_v6, %v289_v8  ;;  %v291_v11 = vsel %vm280_vm0, %v289_v8, %v287_v6 }
  0x88   : > { %v833_v12 = vsub.f32 %v290_v10, %v800_v0  ;;  %v836_v13 = vsub.f32 %v291_v11, %v808_v2 }
  0x8a   : > { %v304_v14 = vmul.f32 %v833_v12, %v833_v12  ;;  %v305_v15 = vmul.f32 %v836_v13, %v836_v13  ;;  %v340_v16 = vpop.permute.xlu1 %339 }
  0x8b   : > { %v277_v17 = vpop.permute.xlu0 %276  ;;  %v342_v18 = vsel %vm341_vm1, %v338_v9, %v340_v16  ;;  %v343_v19 = vsel %vm341_vm1, %v340_v16, %v338_v9 }
  0x8c   : > { %v281_v20 = vsel %vm280_vm0, %v275_v7, %v277_v17  ;;  %v282_v21 = vsel %vm280_vm0, %v277_v17, %v275_v7  ;;  %v306_v22 = vadd.f32 0.81, %v304_v14  ;;  %v848_v23 = vsub.f32 %v342_v18, %v802_v1 }
  0x8d   : > { %v851_v24 = vsub.f32 %v343_v19, %v814_v3  ;;  %v307_v25 = vadd.f32 0.81, %v305_v15  ;;  %v854_v26 = vsub.f32 %v281_v20, %v802_v1  ;;  %v857_v27 = vsub.f32 %v282_v21, %v814_v3 }
  0x8e   : > { %v354_v28 = vmul.f32 %v848_v23, %v848_v23  ;;  %v347_v30 = vpop.permute.xlu1 %346  ;;  %676 = vrsqrt.f32 %v306_v22 }
  0x8f   : > { %v355_v29 = vmul.f32 %v851_v24, %v851_v24  ;;  %v345_v31 = vpop.permute.xlu0 %344  ;;  %v296_v32 = vmul.f32 %v854_v26, %v854_v26  ;;  %v297_v33 = vmul.f32 %v857_v27, %v857_v27  ;;  %678 = vrsqrt.f32 %v307_v25 }
  0x90   : > { %v348_v34 = vsel %vm341_vm1, %v345_v31, %v347_v30  ;;  %v356_v35 = vadd.f32 0.81, %v354_v28  ;;  %v349_v37 = vsel %vm341_vm1, %v347_v30, %v345_v31 }
  0x91   : > { %v357_v36 = vadd.f32 0.81, %v355_v29  ;;  %v873_v38 = vsub.f32 %v348_v34, %v800_v0  ;;  %v298_v39 = vadd.f32 0.81, %v296_v32  ;;  %v299_v40 = vadd.f32 0.81, %v297_v33 }
  0x92   : > { %v876_v41 = vsub.f32 %v349_v37, %v808_v2  ;;  %680 = vrsqrt.f32 %v356_v35  ;;  %v398_v43 = vpop.permute.xlu1 %397 }
  0x93   : > { %v362_v42 = vmul.f32 %v873_v38, %v873_v38  ;;  %v396_v44 = vpop.permute.xlu0 %395  ;;  %682 = vrsqrt.f32 %v357_v36 }
  0x94   : > { %v363_v45 = vmul.f32 %v876_v41, %v876_v41  ;;  %v400_v46 = vsel %vm399_vm2, %v396_v44, %v398_v43  ;;  %v401_v47 = vsel %vm399_vm2, %v398_v43, %v396_v44  ;;  %684 = vrsqrt.f32 %v298_v39 }
  0x95   : > { %v364_v48 = vadd.f32 0.81, %v362_v42  ;;  %v887_v49 = vsub.f32 %v400_v46, %v802_v1  ;;  %v890_v50 = vsub.f32 %v401_v47, %v814_v3  ;;  %686 = vrsqrt.f32 %v299_v40 }
  0x96   : > { %v365_v51 = vadd.f32 0.81, %v363_v45  ;;  %v405_v54 = vpop.permute.xlu1 %404 }
  0x97   : > { %688 = vrsqrt.f32 %v364_v48  ;;  %v412_v52 = vmul.f32 %v887_v49, %v887_v49  ;;  %v413_v53 = vmul.f32 %v890_v50, %v890_v50  ;;  %v403_v55 = vpop.permute.xlu0 %402 }
  0x98   : > { %690 = vrsqrt.f32 %v365_v51  ;;  %v406_v56 = vsel %vm399_vm2, %v403_v55, %v405_v54  ;;  %v407_v57 = vsel %vm399_vm2, %v405_v54, %v403_v55 }
  0x99   : > { %v414_v58 = vadd.f32 0.81, %v412_v52  ;;  %v901_v59 = vsub.f32 %v406_v56, %v800_v0  ;;  %v904_v60 = vsub.f32 %v407_v57, %v808_v2  ;;  %v415_v61 = vadd.f32 0.81, %v413_v53 }
  0x9a   : > { %v456_v6 = vpop.permute.xlu1 %455 }
  0x9b   : > { %v420_v62 = vmul.f32 %v901_v59, %v901_v59  ;;  %v421_v63 = vmul.f32 %v904_v60, %v904_v60  ;;  %v454_v7 = vpop.permute.xlu0 %453  ;;  %v677_v10 = vpop.eup %676  ;;  %692 = vrsqrt.f32 %v414_v58 }
  0x9c   : > { %v458_v8 = vsel %vm457_vm3, %v454_v7, %v456_v6  ;;  %v459_v9 = vsel %vm457_vm3, %v456_v6, %v454_v7  ;;  %694 = vrsqrt.f32 %v415_v61  ;;  %v679_v17 = vpop.eup %678  ;;  %v310_v34 = vmul.f32 %v677_v10, %v833_v12 }
  0x9d   : > { %v422_v11 = vadd.f32 0.81, %v420_v62  ;;  %v423_v14 = vadd.f32 0.81, %v421_v63  ;;  %v916_v15 = vsub.f32 %v458_v8, %v802_v1  ;;  %v919_v16 = vsub.f32 %v459_v9, %v814_v3 }
  0x9e   : > { %v463_v19 = vpop.permute.xlu1 %462  ;;  %v311_v40 = vmul.f32 %v679_v17, %v836_v13 }
  0x9f   : > { %696 = vrsqrt.f32 %v422_v11  ;;  %v470_v18 = vmul.f32 %v916_v15, %v916_v15  ;;  %v461_v20 = vpop.permute.xlu0 %460  ;;  %v681_v21 = vpop.eup %680  ;;  %v471_v22 = vmul.f32 %v919_v16, %v919_v16 }
  0xa0   : > { %698 = vrsqrt.f32 %v423_v14  ;;  %v464_v1 = vsel %vm457_vm3, %v461_v20, %v463_v19  ;;  %v465_v25 = vsel %vm457_vm3, %v463_v19, %v461_v20  ;;  %v683_v3 = vpop.eup %682  ;;  %v360_v5 = vmul.f32 %v681_v21, %v848_v23 }
  0xa1   : > { %v472_v28 = vadd.f32 0.81, %v470_v18  ;;  %v468_v29 = vsub.f32 %v464_v1, %v800_v0  ;;  %v469_v30 = vsub.f32 %v465_v25, %v808_v2  ;;  %v685_v31 = vpop.eup %684  ;;  %v473_v32 = vadd.f32 0.81, %v471_v22 }
  0xa2   : > { %v687_v33 = vpop.eup %686  ;;  %v302_v35 = vmul.f32 %v685_v31, %v854_v26  ;;  %v361_v12 = vmul.f32 %v683_v3, %v851_v24  ;;  %v324_v3 = vshrl.u32 %v278_v4, 7  ;;  %v637_v4 = vld [vmem:[%s971_s0 + $0x2] ss:$4 sm:$0x3] }
  0xa3   : > { %v478_v36 = vmul.f32 %v468_v29, %v468_v29  ;;  %v479_v37 = vmul.f32 %v469_v30, %v469_v30  ;;  %v303_v42 = vmul.f32 %v687_v33, %v857_v27  ;;  %700 = vrsqrt.f32 %v472_v28 }
  0xa4   : > { %v689_v39 = vpop.eup %688  ;;  %v312_v43 = vsub.f32 %v302_v35, %v310_v34  ;;  %702 = vrsqrt.f32 %v473_v32  ;;  %v262_v34 = vld [vmem:[%s971_s0] ss:$4 sm:$0x3] }
  0xa5   : > { %v691_v0 = vpop.eup %690  ;;  %v368_v2 = vmul.f32 %v689_v39, %v873_v38  ;;  %v480_v44 = vadd.f32 0.81, %v478_v36  ;;  %v481_v45 = vadd.f32 0.81, %v479_v37  ;;  %v313_v46 = vsub.f32 %v303_v42, %v311_v40 }
  0xa6   : > { %v369_v26 = vmul.f32 %v691_v0, %v876_v41  ;;  %v314_v23 = vmul.f32 %v312_v43, %v312_v43 }
  0xa7   : > { %v370_v47 = vsub.f32 %v360_v5, %v368_v2  ;;  %704 = vrsqrt.f32 %v480_v44  ;;  %v315_v27 = vmul.f32 %v313_v46, %v313_v46 }
  0xa8   : > { %v371_v13 = vsub.f32 %v361_v12, %v369_v26  ;;  %706 = vrsqrt.f32 %v481_v45  ;;  %v693_v48 = vpop.eup %692  ;;  %v316_v55 = vadd.f32 0.1, %v314_v23  ;;  %v638_v45 = vld [vmem:[%s971_s0 + $0x3] ss:$4 sm:$0x3] }
  0xa9   : > { %v695_v51 = vpop.eup %694  ;;  %v372_v52 = vmul.f32 %v370_v47, %v370_v47  ;;  %v418_v56 = vmul.f32 %v693_v48, %v887_v49  ;;  %v317_v57 = vadd.f32 0.1, %v315_v27 }
  0xaa   : > { %v373_v54 = vmul.f32 %v371_v13, %v371_v13  ;;  %v419_v41 = vmul.f32 %v695_v51, %v890_v50  ;;  %708 = vrcp.f32 %v316_v55 }
  0xab   : > { %v374_v61 = vadd.f32 0.1, %v372_v52  ;;  %710 = vrcp.f32 %v317_v57 }
  0xac   : > { %v697_v53 = vpop.eup %696  ;;  %v375_v63 = vadd.f32 0.1, %v373_v54 }
  0xad   : > { %v699_v38 = vpop.eup %698  ;;  %v426_v24 = vmul.f32 %v697_v53, %v901_v59  ;;  %712 = vrcp.f32 %v374_v61 }
  0xae   : > { %v427_v58 = vmul.f32 %v699_v38, %v904_v60  ;;  %714 = vrcp.f32 %v375_v63 }
  0xaf   : > { %v428_v62 = vsub.f32 %v418_v56, %v426_v24 }
  0xb0   : > { %v429_v6 = vsub.f32 %v419_v41, %v427_v58  ;;  %v701_v7 = vpop.eup %700 }
  0xb1   : > { %v430_v8 = vmul.f32 %v428_v62, %v428_v62  ;;  %v703_v10 = vpop.eup %702  ;;  %v476_v50 = vmul.f32 %v701_v7, %v916_v15  ;;  %v636_v15 = vld [vmem:[%s971_s0 + $0x1] ss:$4 sm:$0x3] }
  0xb2   : > { %v431_v9 = vmul.f32 %v429_v6, %v429_v6  ;;  %v477_v17 = vmul.f32 %v703_v10, %v919_v16  ;;  %v325_v16 = vsub.s32 0, %v324_v3 }
  0xb3   : > { %v432_v11 = vadd.f32 0.1, %v430_v8 }
  0xb4   : > { %v705_v49 = vpop.eup %704  ;;  %v433_v59 = vadd.f32 0.1, %v431_v9  ;;  %v384_v37 = vrot.slane %v636_v15, %v325_v16  ;;  %v326_v0 = vrot.slane %v262_v34, %v325_v16  ;;  %v442_v43 = vrot.slane %v637_v4, %v325_v16 }
  0xb5   : > { %v707_v14 = vpop.eup %706  ;;  %716 = vrcp.f32 %v432_v11  ;;  %v484_v60 = vmul.f32 %v705_v49, %v468_v29  ;;  %v500_v51 = vrot.slane %v638_v45, %v325_v16 }
  0xb6   : > { %718 = vrcp.f32 %v433_v59  ;;  %v485_v18 = vmul.f32 %v707_v14, %v469_v30  ;;  %v329_v30 = vsub.s32 1, %v324_v3 }
  0xb7   : > { %v486_v19 = vsub.f32 %v476_v50, %v484_v60  ;;  %v709_v28 = vpop.eup %708 }
  0xb8   : > { %v487_v20 = vsub.f32 %v477_v17, %v485_v18  ;;  %v711_v31 = vpop.eup %710  ;;  %v388_v40 = vrot.slane %v636_v15, %v329_v30  ;;  %v320_v5 = vmul.f32 %v709_v28, %v314_v23  ;;  %v330_v12 = vrot.slane %v262_v34, %v329_v30 }
  0xb9   : > { %v488_v21 = vmul.f32 %v486_v19, %v486_v19  ;;  %v321_v2 = vmul.f32 %v711_v31, %v315_v27  ;;  %v446_v46 = vrot.slane %v637_v4, %v329_v30  ;;  %v504_v23 = vrot.slane %v638_v45, %v329_v30 }
  0xba   : > { %v489_v22 = vmul.f32 %v487_v20, %v487_v20  ;;  %v713_v32 = vpop.eup %712  ;;  %v333_v13 = vmul.f32 %v326_v0, %v320_v5 }
  0xbb   : > { %v490_v1 = vadd.f32 0.1, %v488_v21  ;;  %v715_v29 = vpop.eup %714  ;;  %v378_v36 = vmul.f32 %v713_v32, %v372_v52  ;;  %v334_v53 = vmul.f32 %v330_v12, %v321_v2 }
  0xbc   : > { %v491_v25 = vadd.f32 0.1, %v489_v22  ;;  %v379_v39 = vmul.f32 %v715_v29, %v373_v54 }
  0xbd   : > { %720 = vrcp.f32 %v490_v1  ;;  %v391_v26 = vmul.f32 %v384_v37, %v378_v36 }
  0xbe   : > { %722 = vrcp.f32 %v491_v25  ;;  %v392_v47 = vmul.f32 %v388_v40, %v379_v39 }
  0xbf   : > { %v393_v55 = vadd.f32 %v391_v26, %v333_v13 }
  0xc0   : > { %v394_v56 = vadd.f32 %v392_v47, %v334_v53 }
  0xc2   : > { %v717_v33 = vpop.eup %716 }
  0xc3   : > { %v719_v35 = vpop.eup %718  ;;  %v436_v42 = vmul.f32 %v717_v33, %v430_v8 }
  0xc4   : > { %v437_v44 = vmul.f32 %v719_v35, %v431_v9  ;;  %v752_v9 = vmov 0.0  }
  0xc5   : > { %v449_v48 = vmul.f32 %v442_v43, %v436_v42  ;;  %261 = vst.msk [vmem:[%s255_s10] sm:$0x1] %vm260_vm5, %v752_v9 }
  0xc6   : > { %v450_v54 = vmul.f32 %v446_v46, %v437_v44 }
  0xc7   : > { %v451_v57 = vadd.f32 %v449_v48, %v393_v55 }
  0xc8   : > { %v452_v58 = vadd.f32 %v450_v54, %v394_v56 }
  0xca   : > { %v721_v52 = vpop.eup %720 }
  0xcb   : > { %v723_v38 = vpop.eup %722  ;;  %v494_v27 = vmul.f32 %v721_v52, %v488_v21 }
  0xcc   : > { %v495_v24 = vmul.f32 %v723_v38, %v489_v22  ;;  %v524_v17 = vld [vmem:[%s255_s10] sm:$0x1] }
  0xcd   : > { %v507_v41 = vmul.f32 %v500_v51, %v494_v27 }
  0xce   : > { %v508_v61 = vmul.f32 %v504_v23, %v495_v24 }
  0xcf   : > { %v509_v62 = vadd.f32 %v507_v41, %v451_v57 }
  0xd0   : > { %v510_v63 = vadd.f32 %v508_v61, %v452_v58 }
  0xd1   : > { %v512_v6 = vsel %vm511_vm4, %v509_v62, 0.0 }
  0xd2   : > { %v513_v7 = vsel %vm511_vm4, %v510_v63, 0.0 }
  0xd3   : > { %v514_v8 = vadd.f32 %v513_v7, %v512_v6 }
  0xd5   : > { %515 = vadd.xlane.f32.xlu0 %v514_v8 }
 0x15e   : > { %v516_v10 = vpop.xlane.xlu0 %515 }
 0x15f   : > { %v517_v11 = vrot.slane %v516_v10, 4 }
 0x161   : > { %v518_v49 = vadd.f32 %v517_v11, %v516_v10 }
 0x163   : > { %v519_v59 = vrot.slane %v518_v49, 2 }
 0x165   : > { %v520_v14 = vadd.f32 %v519_v59, %v518_v49 }
 0x167   : > { %v521_v50 = vrot.slane %v520_v14, 1 }
 0x169   : > { %v522_v60 = vadd.f32 %v521_v50, %v520_v14 }
 0x16b   : > { %643 = vpush %v522_v60 }
 0x19c   : > { %s644_s11 = spop %643 }
 0x19d   : > { %v525_v18 = vstv %s644_s11 }
 0x19e   : > { %v526_v19 = vadd.f32 %v525_v18, %v524_v17 }
 0x1a0   : > { %528 = vst.msk [vmem:[%s255_s10] sm:$0x1] %vm260_vm5, %v526_v19 }
 0x1a1 PF: > { %s13_s14 = sadd.s32 1, %s746_s14   ;;  %s975_s12 = smov %s742_s13 }
 0x1a2   : > { %p10_p5 = scmp.ge.s32.totalorder %s13_s14, 4   ;;  %s976_s13 = smov %s978_s15 }
 0x1a4   :  { %12 = sbr.rel (!%p10_p5) target bundleno = 2 (0x2), region = 72 }

</bundles_post_ra>
